<compile_context>
chip_gen: v7x
topology: tpu7x:2x2x1
jax: 0.10.0
libtpu: 0.0.40
codegen_flags: <defaults>
</compile_context>

<pallas_src>
import jax
import jax.numpy as jnp
from jax import lax
from jax.experimental import pallas as pl
from jax.experimental.pallas import tpu as pltpu


def mlp_kernel(x_ref, w1_ref, b1_ref, w2_ref, b2_ref, o_ref):
    # x: (TB, D)  w1: (H, D)  b1: (1, H)  w2: (1, H)  b2: SMEM (1,)  o: (TB, 1)
    h = lax.dot_general(
        x_ref[...], w1_ref[...],
        dimension_numbers=(((1,), (1,)), ((), ())),
        preferred_element_type=jnp.float32,
    )                                                       # MXU: (TB, H)
    h = jnp.maximum(h + b1_ref[...], 0.0)                   # VPU: bias + ReLU
    # Output head (N=1): VPU multiply + lane reduction instead of an MXU matmul.
    y = jnp.sum(h * w2_ref[...], axis=1, keepdims=True)     # (TB, 1)
    o_ref[...] = (y + b2_ref[0]).astype(o_ref.dtype)


def _pick_block_b(D, H, budget_bytes=40 * 1024 * 1024, max_tb=2048):
    """Largest batch tile (multiple of 256, <= max_tb) fitting the VMEM budget."""
    fixed = 4 * (H * D + 2 * H)              # resident W1 + b1 + w2 (f32)
    per_row = 4 * (2 * D + H + 2)            # 2x x double-buffer + h + out bufs
    tb = (budget_bytes - fixed) // max(per_row, 1)
    tb = int(min(tb, max_tb))
    tb = (tb // 256) * 256
    return max(tb, 256)


def mlp_forward(x, w1, b1, w2, b2, *, block_b=None, use_bf16=False):
    """x: (B, D); w1: (H, D) (torch layout); b1: (H,); w2: (1, H); b2: (1,)."""
    B, D = x.shape
    H = w1.shape[0]
    out_dtype = x.dtype

    if block_b is None:
        block_b = _pick_block_b(D, H)

    # Batch tile: at most the whole batch; keep G >= 2 for large B so the
    # "parallel" grid axis actually shards across both v7x TensorCores.
    TB = min(block_b, B)
    if B > 512 and pl.cdiv(B, TB) < 2:
        TB = max(256, ((B // 2 + 255) // 256) * 256)
    G = pl.cdiv(B, TB)

    if use_bf16:
        # Halves x HBM traffic in the mem-bound regime; f32 accumulation kept.
        x = x.astype(jnp.bfloat16)
        w1 = w1.astype(jnp.bfloat16)

    b1c = b1.reshape(1, H).astype(jnp.float32)
    w2c = w2.reshape(1, H).astype(jnp.float32)
    b2s = b2.reshape(1).astype(jnp.float32)

    cost = pl.CostEstimate(
        flops=2 * B * D * H + 4 * B * H,
        transcendentals=0,
        bytes_accessed=B * D * x.dtype.itemsize + H * D * w1.dtype.itemsize
        + B * 4,
    )

    out = pl.pallas_call(
        mlp_kernel,
        out_shape=jax.ShapeDtypeStruct((B, 1), out_dtype),
        grid_spec=pltpu.PrefetchScalarGridSpec(
            num_scalar_prefetch=0,
            grid=(G,),
            in_specs=[
                pl.BlockSpec((TB, D), lambda i: (i, 0)),        # x tile (pipelined)
                pl.BlockSpec((H, D), lambda i: (0, 0)),         # W1 (resident)
                pl.BlockSpec((1, H), lambda i: (0, 0)),         # b1 row (resident)
                pl.BlockSpec((1, H), lambda i: (0, 0)),         # w2 row (resident)
                pl.BlockSpec(memory_space=pltpu.MemorySpace.SMEM),  # b2 scalar
            ],
            out_specs=pl.BlockSpec((TB, 1), lambda i: (i, 0)),
        ),
        compiler_params=pltpu.CompilerParams(
            dimension_semantics=("parallel",),   # megacore-shard the batch axis
            vmem_limit_bytes=48 * 1024 * 1024,   # > v5e/v6e defaults, < v7x 64 MiB
        ),
        cost_estimate=cost,
    )(x, w1, b1c, w2c, b2s)

    return out


def init_params(key, input_dim, hidden_size):
    k1, k2, k3, k4 = jax.random.split(key, 4)
    # fc1: xavier_uniform_ on weight of shape (hidden, input_dim).
    limit1 = (6.0 / (input_dim + hidden_size)) ** 0.5
    w1 = jax.random.uniform(k1, (hidden_size, input_dim), jnp.float32,
                            minval=-limit1, maxval=limit1)
    # torch Linear default bias init: U(-1/sqrt(fan_in), 1/sqrt(fan_in))
    b1 = jax.random.uniform(k2, (hidden_size,), jnp.float32,
                            minval=-1.0 / input_dim ** 0.5,
                            maxval=1.0 / input_dim ** 0.5)
    # shape_outputs: torch default init, weight shape (1, hidden).
    limit2 = 1.0 / hidden_size ** 0.5
    w2 = jax.random.uniform(k3, (1, hidden_size), jnp.float32,
                            minval=-limit2, maxval=limit2)
    b2 = jax.random.uniform(k4, (1,), jnp.float32,
                            minval=-limit2, maxval=limit2)
    return w1, b1, w2, b2


if __name__ == "__main__":
    batch = 8
    input_dim = 32
    hidden_size = 64

    key = jax.random.PRNGKey(0)
    kx, kp = jax.random.split(key)
    x = jax.random.normal(kx, (batch, input_dim), jnp.float32)
    w1, b1, w2, b2 = init_params(kp, input_dim, hidden_size)

    y = mlp_forward(x, w1, b1, w2, b2)
    jax.block_until_ready(y)

    # Reference check in plain JAX (PyTorch semantics: x @ W.T + b).
    ref = jnp.maximum(x @ w1.T + b1, 0.0) @ w2.T + b2
    assert y.shape == (batch, 1)
    assert jnp.allclose(y, ref, atol=1e-5, rtol=1e-5)

    # Also exercise a multi-tile, non-divisible batch to cover partial blocks.
    xb = jax.random.normal(kx, (1000, input_dim), jnp.float32)
    yb = mlp_forward(xb, w1, b1, w2, b2, block_b=512)
    jax.block_until_ready(yb)
    refb = jnp.maximum(xb @ w1.T + b1, 0.0) @ w2.T + b2
    assert yb.shape == (1000, 1)
    assert jnp.allclose(yb, refb, atol=1e-5, rtol=1e-5)

    print("KERNEL_OK")
</pallas_src>

<mosaic_0001>
module attributes {stable_mosaic.version = 11 : i64} {
  func.func @mlp_kernel(%arg0: i32, %arg1: memref<8x32xf32, #tpu.memory_space<vmem>>, %arg2: memref<64x32xf32, #tpu.memory_space<vmem>>, %arg3: memref<1x64xf32, #tpu.memory_space<vmem>>, %arg4: memref<1x64xf32, #tpu.memory_space<vmem>>, %arg5: memref<1xf32, #tpu.memory_space<smem>>, %arg6: memref<8x1xf32, #tpu.memory_space<vmem>>) attributes {dimension_semantics = [#tpu.dimension_semantics<parallel>], iteration_bounds = array<i64: 1>, scalar_prefetch = 0 : i64, scratch_operands = 0 : i64, tpu.core_type = #tpu.core_type<tc>, window_params = [{transform_indices = @transform_0, window_bounds = array<i64: 8, 32>}, {pipeline_mode = #tpu.pipeline_mode<synchronous>, transform_indices = @transform_1, window_bounds = array<i64: 64, 32>}, {pipeline_mode = #tpu.pipeline_mode<synchronous>, transform_indices = @transform_2, window_bounds = array<i64: 1, 64>}, {pipeline_mode = #tpu.pipeline_mode<synchronous>, transform_indices = @transform_3, window_bounds = array<i64: 1, 64>}, {transform_indices = @transform_4, window_bounds = array<i64: 1>}, {transform_indices = @transform_5, window_bounds = array<i64: 8, 1>}]} {
    %c0 = arith.constant 0 : index
    %c0_0 = arith.constant 0 : index
    %0 = vector.load %arg1[%c0, %c0_0] : memref<8x32xf32, #tpu.memory_space<vmem>>, vector<8x32xf32>
    %c0_1 = arith.constant 0 : index
    %c0_2 = arith.constant 0 : index
    %1 = vector.load %arg2[%c0_1, %c0_2] : memref<64x32xf32, #tpu.memory_space<vmem>>, vector<64x32xf32>
    %cst = arith.constant dense<0.000000e+00> : vector<8x64xf32>
    %2 = tpu.matmul %0, %1, %cst {dimension_numbers = #tpu.dot_dimension_numbers<[1], [1], [0], [0], [0, 0, 1, 0], [], []>} : vector<8x32xf32>, vector<64x32xf32>, vector<8x64xf32> -> vector<8x64xf32>
    %c0_3 = arith.constant 0 : index
    %c0_4 = arith.constant 0 : index
    %3 = vector.load %arg3[%c0_3, %c0_4] : memref<1x64xf32, #tpu.memory_space<vmem>>, vector<1x64xf32>
    %4 = vector.broadcast %3 : vector<1x64xf32> to vector<8x64xf32>
    %5 = arith.addf %2, %4 : vector<8x64xf32>
    %cst_5 = arith.constant 0.000000e+00 : f32
    %6 = vector.broadcast %cst_5 : f32 to vector<8x64xf32>
    %7 = arith.maximumf %5, %6 : vector<8x64xf32>
    %c0_6 = arith.constant 0 : index
    %c0_7 = arith.constant 0 : index
    %8 = vector.load %arg4[%c0_6, %c0_7] : memref<1x64xf32, #tpu.memory_space<vmem>>, vector<1x64xf32>
    %9 = vector.broadcast %8 : vector<1x64xf32> to vector<8x64xf32>
    %10 = arith.mulf %7, %9 : vector<8x64xf32>
    %cst_8 = arith.constant dense<0.000000e+00> : vector<8xf32>
    %11 = vector.multi_reduction <add>, %10, %cst_8 [1] : vector<8x64xf32> to vector<8xf32>
    %12 = vector.shape_cast %11 : vector<8xf32> to vector<8x1xf32>
    %c0_9 = arith.constant 0 : index
    %13 = memref.load %arg5[%c0_9] : memref<1xf32, #tpu.memory_space<smem>>
    %14 = vector.broadcast %13 : f32 to vector<8x1xf32>
    %15 = arith.addf %12, %14 : vector<8x1xf32>
    %c0_10 = arith.constant 0 : index
    %c0_11 = arith.constant 0 : index
    %16 = vector.load %arg6[%c0_10, %c0_11] : memref<8x1xf32, #tpu.memory_space<vmem>>, vector<8x1xf32>
    tpu.vector_store %arg6[%c0_10, %c0_11], %15 {strides = array<i32>} : memref<8x1xf32, #tpu.memory_space<vmem>>, vector<8x1xf32>,
    return
  }
  func.func @transform_0(%arg0: i32) -> (i32, i32) {
    %c0_i32 = arith.constant 0 : i32
    %c0_i32_0 = arith.constant 0 : i32
    return %arg0, %c0_i32 : i32, i32
  }
  func.func @transform_1(%arg0: i32) -> (i32, i32) {
    %c0_i32 = arith.constant 0 : i32
    %c0_i32_0 = arith.constant 0 : i32
    %c0_i32_1 = arith.constant 0 : i32
    return %c0_i32, %c0_i32_0 : i32, i32
  }
  func.func @transform_2(%arg0: i32) -> (i32, i32) {
    %c0_i32 = arith.constant 0 : i32
    %c0_i32_0 = arith.constant 0 : i32
    %c0_i32_1 = arith.constant 0 : i32
    return %c0_i32, %c0_i32_0 : i32, i32
  }
  func.func @transform_3(%arg0: i32) -> (i32, i32) {
    %c0_i32 = arith.constant 0 : i32
    %c0_i32_0 = arith.constant 0 : i32
    %c0_i32_1 = arith.constant 0 : i32
    return %c0_i32, %c0_i32_0 : i32, i32
  }
  func.func @transform_4(%arg0: i32) -> i32 {
    %c0_i32 = arith.constant 0 : i32
    %c0_i32_0 = arith.constant 0 : i32
    return %c0_i32 : i32
  }
  func.func @transform_5(%arg0: i32) -> (i32, i32) {
    %c0_i32 = arith.constant 0 : i32
    %c0_i32_0 = arith.constant 0 : i32
    return %arg0, %c0_i32 : i32, i32
  }
}

</mosaic_0001>

<bundles_post_ra>
// kernel: tpu_custom_call.1
= control target key start
LH: loop header
LB: loop body
LE: loop exit
PB: predicated region body
PF: predicated region fallthrough
CT: control target
= control target key end

     0   :  { %vm37_vm0 = vcmask 261120   ;;  %v215_v0 = vmov 0.0|0.0   ;;  %vm216_vm2 = vmmov 0   ;;  %v217_v4 = vmov 0.0   ;;  %s302_s1 = inlined_call_operand.vmem [shape: f32[64,32], index: 1, kind: input, shape index: {}]   ;;  %s303_s0 = inlined_call_operand.vmem [shape: f32[8,32], index: 0, kind: input, shape index: {}]   ;;  %s304_s2 = inlined_call_operand.vmem [shape: f32[1,64], index: 2, kind: input, shape index: {}]   ;;  %s305_s3 = inlined_call_operand.vmem [shape: f32[1,64], index: 3, kind: input, shape index: {}]   ;;  %s306_s4 = inlined_call_operand.<no memory space> [shape: f32[1], index: 4, kind: input, shape index: {}]   ;;  %s307_s5 = inlined_call_operand.vmem [shape: f32[8,1], index: 5, kind: output, shape index: {}]  }
   0x1   :  { %196 = vmatprep.subr.bf16.mxu0 %v215_v0  ;;  %v22_v1 = vld [vmem:[%s302_s1] sm:$0xff]  ;;  %v23_v2 = vld [vmem:[%s302_s1 + $0x8] sm:$0xff]  ;;  %vm256_vm1 = vmpackc.low %vm37_vm0, %vm37_vm0  ;;  %193 = vmatprep.mubr.msk.f32.mxu0 %vm216_vm2, %v217_v4  ;;  %vm144_vm3 = vcmask 523264   ;;  %v149_v24 = vstv %s306_s4  ;;  %vm151_vm4 = vcmask 7168  }
   0x2   :  { %v197_v5 = vpack.c.bf16 %v23_v2, %v22_v1  ;;  %v24_v6 = vld [vmem:[%s302_s1 + $0x10] sm:$0xff]  ;;  %v25_v7 = vld [vmem:[%s302_s1 + $0x18] sm:$0xff]  ;;  %v26_v9 = vld [vmem:[%s302_s1 + $0x20] sm:$0xff] }
   0x3   :  { %v201_v8 = vpack.c.bf16 %v25_v7, %v24_v6  ;;  %v27_v10 = vld [vmem:[%s302_s1 + $0x28] sm:$0xff]  ;;  %v28_v12 = vld [vmem:[%s302_s1 + $0x30] sm:$0xff]  ;;  %v29_v13 = vld [vmem:[%s302_s1 + $0x38] sm:$0xff] }
   0x4   :  { %199 = vmatpush3.bf16.xpose.msk.msra.mxu0 %vm256_vm1, %v197_v5  ;;  %v205_v11 = vpack.c.bf16 %v27_v10, %v26_v9  ;;  %v209_v14 = vpack.c.bf16 %v29_v13, %v28_v12  ;;  %v21_v15 = vld [vmem:[%s303_s0] sm:$0xff] }
   0x5   :  { %200 = vmatprep.subr.bf16.mxu0 %v215_v0  ;;  %v157_v16 = vld [vmem:[%s304_s2] ss:$0 sm:$0xff] }
   0x6   :  { %v167_v20 = vld [vmem:[%s305_s3] ss:$0 sm:$0xff] }
   0xc   :  { %203 = vmatpush3.bf16.xpose.msk.msra.mxu0 %vm256_vm1, %v201_v8 }
   0xd   :  { %204 = vmatprep.subr.bf16.mxu0 %v215_v0 }
  0x14   :  { %207 = vmatpush3.bf16.xpose.msk.msra.mxu0 %vm256_vm1, %v205_v11 }
  0x15   :  { %208 = vmatprep.subr.bf16.mxu0 %v215_v0 }
  0x1c   :  { %211 = vmatpush3.bf16.xpose.msk.msra.mxu0 %vm256_vm1, %v209_v14 }
  0x23   :  { %194 = vmatmul.mubr.msk.f32.vlgmr.msra.gmra.mrb[0].mxu0 %vm37_vm0, %v21_v15 }
  0xf6   :  { %v131_v17 = vpop.f32.mrb[0].mxu0 }
  0xf7   :  { %v132_v18 = vadd.f32 %v157_v16, %v131_v17  ;;  %v195_v19 = vpop.f32.mrb[1].mxu0 }
  0xf9   :  { %v135_v21 = vmax.f32 %v132_v18, 0.0 }
  0xfb   :  { %v143_v22 = vmul.f32 %v167_v20, %v135_v21 }
  0xfd   :  { %v145_v23 = vsel %vm144_vm3, %v143_v22, 0.0 }
  0xfe   :  { %146 = vadd.xlane.f32.xlu0 %v145_v23 }
 0x18b   :  { %v147_v25 = vpop.xlane.xlu0 %146 }
 0x18c   :  { %v150_v26 = vadd.f32 %v149_v24, %v147_v25 }
 0x18e   :  { %152 = vst.msk [vmem:[%s307_s5] sm:$0xff] %vm151_vm4, %v150_v26 }

</bundles_post_ra>
